<compile_context>
chip_gen: v6e
topology: v6e:2x2x1
jax: 0.10.0
libtpu: 0.0.40
codegen_flags: <defaults>
</compile_context>

<pallas_src>
import jax
import jax.numpy as jnp
from jax.experimental import pallas as pl
from jax.experimental.pallas import tpu as pltpu

_LANE = 128  # padded hidden width (vreg lane count)


def autoencoder_kernel(x_ref, wf_ref, wm_ref, bm_ref, wl_ref, bl_ref, o_ref):
    """Fused 5-layer MLP (layers 3 and 4 pre-folded) on one [tile_b, D] batch tile.

    Hidden activations are kept lane-dense at width 128 (real channels in the low
    lanes, exact zeros in the padding). Matmuls run on the MXU in the compute dtype
    (bf16 by default) with f32 accumulation; bias + ReLU are done in f32.
    """
    f32 = jnp.float32
    cdt = wm_ref.dtype
    biases = bm_ref[...].astype(f32)                       # [8, 128]; rows 0..3 used

    # Layer 1: [tile_b, D] @ [D, 128]  (cols 64..127 of the weight are zero)
    h = jnp.dot(x_ref[...], wf_ref[...], preferred_element_type=f32)
    h = jnp.maximum(h + biases[0:1, :], 0.0).astype(cdt)

    # Layers 2, (3·4 fused), 5: three zero-padded [128, 128] matmuls + ReLU
    for i in range(3):
        w = wm_ref[_LANE * i:_LANE * (i + 1), :]
        h = jnp.dot(h, w, preferred_element_type=f32)
        h = jnp.maximum(h + biases[i + 1:i + 2, :], 0.0).astype(cdt)

    # Final layer: [tile_b, 128] @ [128, D], no activation
    out = jnp.dot(h, wl_ref[...], preferred_element_type=f32)
    out = out + bl_ref[...].astype(f32)
    o_ref[...] = out.astype(o_ref.dtype)


def _pad_to(a, rows, cols):
    r, c = a.shape
    return jnp.pad(a, ((0, rows - r), (0, cols - c)))


def autoencoder_forward(x, params, *, tile_b=256, compute_dtype=jnp.bfloat16):
    """x: [B, D]. params: w{1..6} with shape [in, out], b{1..6} with shape [1, out]."""
    B, D = x.shape
    cdt = compute_dtype

    # ---- Fold the activation-free pair Linear(32,16) -> Linear(16,32) (exact). ----
    w34 = params["w3"] @ params["w4"]                        # [32, 32]
    b34 = params["b3"] @ params["w4"] + params["b4"]         # [1, 32]

    # ---- Pack weights into a few lane-dense (128-wide), zero-padded slabs. ----
    w_first = _pad_to(params["w1"], D, _LANE).astype(cdt)                    # [D, 128]
    w_mid = jnp.concatenate(
        [_pad_to(params["w2"], _LANE, _LANE),
         _pad_to(w34,          _LANE, _LANE),
         _pad_to(params["w5"], _LANE, _LANE)], axis=0).astype(cdt)           # [384, 128]
    b_mid = jnp.concatenate(
        [_pad_to(params["b1"], 1, _LANE),
         _pad_to(params["b2"], 1, _LANE),
         _pad_to(b34,          1, _LANE),
         _pad_to(params["b5"], 1, _LANE),
         jnp.zeros((4, _LANE), jnp.float32)], axis=0)                        # [8, 128] f32
    w_last = _pad_to(params["w6"], _LANE, D).astype(cdt)                     # [128, D]
    b_last = params["b6"].astype(jnp.float32)                                # [1, D]

    # ---- Pad the batch so the grid evenly covers it. ----
    tile_b = max(8, min(tile_b, pl.cdiv(B, 8) * 8))
    B_pad = pl.cdiv(B, tile_b) * tile_b
    x_in = x if B_pad == B else jnp.pad(x, ((0, B_pad - B), (0, 0)))
    x_in = x_in.astype(cdt)

    grid = (B_pad // tile_b,)
    out = pl.pallas_call(
        autoencoder_kernel,
        out_shape=jax.ShapeDtypeStruct((B_pad, D), x.dtype),
        grid_spec=pltpu.PrefetchScalarGridSpec(
            num_scalar_prefetch=0,
            grid=grid,
            in_specs=[
                pl.BlockSpec((tile_b, D), lambda i: (i, 0)),         # x tile
                pl.BlockSpec((D, _LANE), lambda i: (0, 0)),          # w_first
                pl.BlockSpec((3 * _LANE, _LANE), lambda i: (0, 0)),  # w_mid slab
                pl.BlockSpec((8, _LANE), lambda i: (0, 0)),          # bias slab
                pl.BlockSpec((_LANE, D), lambda i: (0, 0)),          # w_last
                pl.BlockSpec((1, D), lambda i: (0, 0)),              # b_last
            ],
            out_specs=pl.BlockSpec((tile_b, D), lambda i: (i, 0)),
        ),
        compiler_params=pltpu.CompilerParams(
            dimension_semantics=("parallel",)),
    )(x_in, w_first, w_mid, b_mid, w_last, b_last)
    return out[:B] if B_pad != B else out


def init_params(key, input_dim):
    """Deterministic init matching the nn.Linear shapes of the module."""
    dims = [(input_dim, 64), (64, 32), (32, 16), (16, 32), (32, 64), (64, input_dim)]
    params = {}
    for idx, (fan_in, fan_out) in enumerate(dims, start=1):
        key, kw, kb = jax.random.split(key, 3)
        bound = 1.0 / (fan_in ** 0.5)  # PyTorch nn.Linear default uniform bound
        params[f"w{idx}"] = jax.random.uniform(
            kw, (fan_in, fan_out), jnp.float32, -bound, bound)
        params[f"b{idx}"] = jax.random.uniform(
            kb, (1, fan_out), jnp.float32, -bound, bound)
    return params


def reference_forward(x, params):
    h = x
    h = jnp.maximum(h @ params["w1"] + params["b1"], 0.0)
    h = jnp.maximum(h @ params["w2"] + params["b2"], 0.0)
    h = h @ params["w3"] + params["b3"]
    h = jnp.maximum(h @ params["w4"] + params["b4"], 0.0)
    h = jnp.maximum(h @ params["w5"] + params["b5"], 0.0)
    h = h @ params["w6"] + params["b6"]
    return h


if __name__ == "__main__":
    input_dim = 32   # X_train.shape[1] in the original script (synthetic choice)
    batch = 512      # 2 grid steps of 256 rows -> both v7x TensorCores get work

    key = jax.random.PRNGKey(0)
    key, kx = jax.random.split(key)
    x = jax.random.normal(kx, (batch, input_dim), jnp.float32)
    params = init_params(key, input_dim)

    out = jax.block_until_ready(autoencoder_forward(x, params, tile_b=256))

    ref = reference_forward(x, params)
    assert out.shape == (batch, input_dim)
    assert out.dtype == x.dtype
    # bf16 matmul inputs with f32 accumulation: errors are O(1e-2) at most here.
    assert jnp.allclose(out, ref, atol=5e-2, rtol=5e-2), (
        f"mismatch vs JAX reference (max abs err {jnp.max(jnp.abs(out - ref))})")

    print("KERNEL_OK")
</pallas_src>

<mosaic_0001>
module attributes {stable_mosaic.version = 11 : i64} {
  func.func @autoencoder_kernel(%arg0: i32, %arg1: memref<256x32xbf16, #tpu.memory_space<vmem>>, %arg2: memref<32x128xbf16, #tpu.memory_space<vmem>>, %arg3: memref<384x128xbf16, #tpu.memory_space<vmem>>, %arg4: memref<8x128xf32, #tpu.memory_space<vmem>>, %arg5: memref<128x32xbf16, #tpu.memory_space<vmem>>, %arg6: memref<1x32xf32, #tpu.memory_space<vmem>>, %arg7: memref<256x32xf32, #tpu.memory_space<vmem>>) attributes {dimension_semantics = [#tpu.dimension_semantics<parallel>], iteration_bounds = array<i64: 2>, scalar_prefetch = 0 : i64, scratch_operands = 0 : i64, tpu.core_type = #tpu.core_type<tc>, window_params = [{transform_indices = @transform_0, window_bounds = array<i64: 256, 32>}, {pipeline_mode = #tpu.pipeline_mode<synchronous>, transform_indices = @transform_1, window_bounds = array<i64: 32, 128>}, {pipeline_mode = #tpu.pipeline_mode<synchronous>, transform_indices = @transform_2, window_bounds = array<i64: 384, 128>}, {pipeline_mode = #tpu.pipeline_mode<synchronous>, transform_indices = @transform_3, window_bounds = array<i64: 8, 128>}, {pipeline_mode = #tpu.pipeline_mode<synchronous>, transform_indices = @transform_4, window_bounds = array<i64: 128, 32>}, {pipeline_mode = #tpu.pipeline_mode<synchronous>, transform_indices = @transform_5, window_bounds = array<i64: 1, 32>}, {transform_indices = @transform_6, window_bounds = array<i64: 256, 32>}]} {
    %c0 = arith.constant 0 : index
    %c0_0 = arith.constant 0 : index
    %0 = vector.load %arg4[%c0, %c0_0] : memref<8x128xf32, #tpu.memory_space<vmem>>, vector<8x128xf32>
    %c0_1 = arith.constant 0 : index
    %c0_2 = arith.constant 0 : index
    %1 = vector.load %arg1[%c0_1, %c0_2] : memref<256x32xbf16, #tpu.memory_space<vmem>>, vector<256x32xbf16>
    %c0_3 = arith.constant 0 : index
    %c0_4 = arith.constant 0 : index
    %2 = vector.load %arg2[%c0_3, %c0_4] : memref<32x128xbf16, #tpu.memory_space<vmem>>, vector<32x128xbf16>
    %cst = arith.constant dense<0.000000e+00> : vector<256x128xf32>
    %3 = tpu.matmul %1, %2, %cst {dimension_numbers = #tpu.dot_dimension_numbers<[1], [0], [0], [1], [0, 0, 1, 1], [], []>} : vector<256x32xbf16>, vector<32x128xbf16>, vector<256x128xf32> -> vector<256x128xf32>
    %4 = vector.extract_strided_slice %0 {offsets = [0, 0], sizes = [1, 128], strides = [1, 1]} : vector<8x128xf32> to vector<1x128xf32>
    %5 = vector.broadcast %4 : vector<1x128xf32> to vector<256x128xf32>
    %6 = arith.addf %3, %5 : vector<256x128xf32>
    %cst_5 = arith.constant 0.000000e+00 : f32
    %7 = vector.broadcast %cst_5 : f32 to vector<256x128xf32>
    %8 = arith.maximumf %6, %7 : vector<256x128xf32>
    %9 = arith.truncf %8 : vector<256x128xf32> to vector<256x128xbf16>
    %c0_6 = arith.constant 0 : index
    %c0_7 = arith.constant 0 : index
    %10 = vector.load %arg3[%c0_6, %c0_7] : memref<384x128xbf16, #tpu.memory_space<vmem>>, vector<128x128xbf16>
    %cst_8 = arith.constant dense<0.000000e+00> : vector<256x128xf32>
    %11 = tpu.matmul %9, %10, %cst_8 {dimension_numbers = #tpu.dot_dimension_numbers<[1], [0], [0], [1], [0, 0, 1, 1], [], []>} : vector<256x128xbf16>, vector<128x128xbf16>, vector<256x128xf32> -> vector<256x128xf32>
    %12 = vector.extract_strided_slice %0 {offsets = [1, 0], sizes = [1, 128], strides = [1, 1]} : vector<8x128xf32> to vector<1x128xf32>
    %13 = vector.broadcast %12 : vector<1x128xf32> to vector<256x128xf32>
    %14 = arith.addf %11, %13 : vector<256x128xf32>
    %cst_9 = arith.constant 0.000000e+00 : f32
    %15 = vector.broadcast %cst_9 : f32 to vector<256x128xf32>
    %16 = arith.maximumf %14, %15 : vector<256x128xf32>
    %17 = arith.truncf %16 : vector<256x128xf32> to vector<256x128xbf16>
    %c128 = arith.constant 128 : index
    %c0_10 = arith.constant 0 : index
    %18 = vector.load %arg3[%c128, %c0_10] : memref<384x128xbf16, #tpu.memory_space<vmem>>, vector<128x128xbf16>
    %cst_11 = arith.constant dense<0.000000e+00> : vector<256x128xf32>
    %19 = tpu.matmul %17, %18, %cst_11 {dimension_numbers = #tpu.dot_dimension_numbers<[1], [0], [0], [1], [0, 0, 1, 1], [], []>} : vector<256x128xbf16>, vector<128x128xbf16>, vector<256x128xf32> -> vector<256x128xf32>
    %20 = vector.extract_strided_slice %0 {offsets = [2, 0], sizes = [1, 128], strides = [1, 1]} : vector<8x128xf32> to vector<1x128xf32>
    %21 = vector.broadcast %20 : vector<1x128xf32> to vector<256x128xf32>
    %22 = arith.addf %19, %21 : vector<256x128xf32>
    %cst_12 = arith.constant 0.000000e+00 : f32
    %23 = vector.broadcast %cst_12 : f32 to vector<256x128xf32>
    %24 = arith.maximumf %22, %23 : vector<256x128xf32>
    %25 = arith.truncf %24 : vector<256x128xf32> to vector<256x128xbf16>
    %c256 = arith.constant 256 : index
    %c0_13 = arith.constant 0 : index
    %26 = vector.load %arg3[%c256, %c0_13] : memref<384x128xbf16, #tpu.memory_space<vmem>>, vector<128x128xbf16>
    %cst_14 = arith.constant dense<0.000000e+00> : vector<256x128xf32>
    %27 = tpu.matmul %25, %26, %cst_14 {dimension_numbers = #tpu.dot_dimension_numbers<[1], [0], [0], [1], [0, 0, 1, 1], [], []>} : vector<256x128xbf16>, vector<128x128xbf16>, vector<256x128xf32> -> vector<256x128xf32>
    %28 = vector.extract_strided_slice %0 {offsets = [3, 0], sizes = [1, 128], strides = [1, 1]} : vector<8x128xf32> to vector<1x128xf32>
    %29 = vector.broadcast %28 : vector<1x128xf32> to vector<256x128xf32>
    %30 = arith.addf %27, %29 : vector<256x128xf32>
    %cst_15 = arith.constant 0.000000e+00 : f32
    %31 = vector.broadcast %cst_15 : f32 to vector<256x128xf32>
    %32 = arith.maximumf %30, %31 : vector<256x128xf32>
    %33 = arith.truncf %32 : vector<256x128xf32> to vector<256x128xbf16>
    %c0_16 = arith.constant 0 : index
    %c0_17 = arith.constant 0 : index
    %34 = vector.load %arg5[%c0_16, %c0_17] : memref<128x32xbf16, #tpu.memory_space<vmem>>, vector<128x32xbf16>
    %cst_18 = arith.constant dense<0.000000e+00> : vector<256x32xf32>
    %35 = tpu.matmul %33, %34, %cst_18 {dimension_numbers = #tpu.dot_dimension_numbers<[1], [0], [0], [1], [0, 0, 1, 1], [], []>} : vector<256x128xbf16>, vector<128x32xbf16>, vector<256x32xf32> -> vector<256x32xf32>
    %c0_19 = arith.constant 0 : index
    %c0_20 = arith.constant 0 : index
    %36 = vector.load %arg6[%c0_19, %c0_20] : memref<1x32xf32, #tpu.memory_space<vmem>>, vector<1x32xf32>
    %37 = vector.broadcast %36 : vector<1x32xf32> to vector<256x32xf32>
    %38 = arith.addf %35, %37 : vector<256x32xf32>
    %c0_21 = arith.constant 0 : index
    %c0_22 = arith.constant 0 : index
    %39 = vector.load %arg7[%c0_21, %c0_22] : memref<256x32xf32, #tpu.memory_space<vmem>>, vector<256x32xf32>
    tpu.vector_store %arg7[%c0_21, %c0_22], %38 {strides = array<i32>} : memref<256x32xf32, #tpu.memory_space<vmem>>, vector<256x32xf32>,
    return
  }
  func.func @transform_0(%arg0: i32) -> (i32, i32) {
    %c0_i32 = arith.constant 0 : i32
    %c0_i32_0 = arith.constant 0 : i32
    return %arg0, %c0_i32 : i32, i32
  }
  func.func @transform_1(%arg0: i32) -> (i32, i32) {
    %c0_i32 = arith.constant 0 : i32
    %c0_i32_0 = arith.constant 0 : i32
    %c0_i32_1 = arith.constant 0 : i32
    return %c0_i32, %c0_i32_0 : i32, i32
  }
  func.func @transform_2(%arg0: i32) -> (i32, i32) {
    %c0_i32 = arith.constant 0 : i32
    %c0_i32_0 = arith.constant 0 : i32
    %c0_i32_1 = arith.constant 0 : i32
    return %c0_i32, %c0_i32_0 : i32, i32
  }
  func.func @transform_3(%arg0: i32) -> (i32, i32) {
    %c0_i32 = arith.constant 0 : i32
    %c0_i32_0 = arith.constant 0 : i32
    %c0_i32_1 = arith.constant 0 : i32
    return %c0_i32, %c0_i32_0 : i32, i32
  }
  func.func @transform_4(%arg0: i32) -> (i32, i32) {
    %c0_i32 = arith.constant 0 : i32
    %c0_i32_0 = arith.constant 0 : i32
    %c0_i32_1 = arith.constant 0 : i32
    return %c0_i32, %c0_i32_0 : i32, i32
  }
  func.func @transform_5(%arg0: i32) -> (i32, i32) {
    %c0_i32 = arith.constant 0 : i32
    %c0_i32_0 = arith.constant 0 : i32
    %c0_i32_1 = arith.constant 0 : i32
    return %c0_i32, %c0_i32_0 : i32, i32
  }
  func.func @transform_6(%arg0: i32) -> (i32, i32) {
    %c0_i32 = arith.constant 0 : i32
    %c0_i32_0 = arith.constant 0 : i32
    return %arg0, %c0_i32 : i32, i32
  }
}

</mosaic_0001>

<bundles_post_ra>
// kernel: tpu_custom_call.1
= control target key start
LH: loop header
LB: loop body
LE: loop exit
PB: predicated region body
PF: predicated region fallthrough
CT: control target
= control target key end

     0   :  { %s2323_s21 = smov 0   ;;  %s2743_s0 = inlined_call_operand.vmem [shape: bf16[512,32], index: 0, kind: input, shape index: {}]   ;;  %s2744_s1 = inlined_call_operand.vmem [shape: bf16[32,128], index: 1, kind: input, shape index: {}]   ;;  %s2745_s2 = inlined_call_operand.vmem [shape: bf16[384,128], index: 2, kind: input, shape index: {}]   ;;  %s2746_s3 = inlined_call_operand.vmem [shape: f32[8,128], index: 3, kind: input, shape index: {}]   ;;  %s2747_s4 = inlined_call_operand.vmem [shape: bf16[128,32], index: 4, kind: input, shape index: {}]   ;;  %s2748_s5 = inlined_call_operand.vmem [shape: f32[1,32], index: 5, kind: input, shape index: {}]   ;;  %s2749_s6 = inlined_call_operand.vmem [shape: f32[512,32], index: 6, kind: output, shape index: {}]  }
   0x1 LB: > { %s1798_s22 = sadd.s32 4294967295, %s2286_s21   ;;  %p1802_p0 = scmp.ge.s32.totalorder %s2286_s21, 1  ;;  %s2286_s21 = sphi %s2323_s21, %s16_s21  }
   0x2   : > { %p213_p1 = scmp.lt.s32.totalorder %s2286_s21, 3 }
   0x4   : > { %p214_p2 = pnand %p1802_p0, %p213_p1 }
   0x5   : > { %s1803_s25 = sshll.u32 (!%p214_p2), %s1798_s22, 5 }
   0x6   : > { %217 = sbr.rel (%p214_p2) target bundleno = 1102 (0x44e), region = 44  ;;  %p244_p3 = scmp.lt.s32.totalorder (!%p214_p2), %s1803_s25, 63 }
   0xb   : > { %v2230_v0 = vld [vmem:[%s2744_s1 + $0x8] sm:$0xff]   ;;  %v2231_v1 = vld [vmem:[%s2744_s1] sm:$0xff]   ;;  %s2751_s25 = smov (!%p244_p3, %s1803_s25), 63  ;;  %v2248_v2 = vld [vmem:[%s2745_s2 + $0x38] sm:$0xff]   ;;  %vm389_vm0 = vcmask 261120   ;;  %v293_v31 = vlaneseq }
   0xc   : > { %1990 = vmatprep.subr.bf16.mxu0 %v2230_v0  ;;  %2218 = vmatprep.subr.bf16.mxu1 %v2230_v0  ;;  %s1804_s30 = sshll.u32 %s2751_s25, 2  ;;  %v2249_v9 = vld [vmem:[%s2745_s2 + $0x30] sm:$0xff]   ;;  %v2250_v12 = vld [vmem:[%s2745_s2 + $0x28] sm:$0xff]   ;;  %v2251_v17 = vld [vmem:[%s2745_s2 + $0x20] sm:$0xff]   ;;  %s1806_s8 = sshll.u32 %s2751_s25, 3 }
   0xd   : > { %1991 = vmatpush3.bf16.msra.mxu0 %v2230_v0  ;;  %2220 = vmatpush3.bf16.msra.mxu1 %v2230_v0  ;;  %s2346_s9 = scalar_lea.vmem %s2743_s0, %s1804_s30  ;;  %v2252_v18 = vld [vmem:[%s2745_s2 + $0x18] sm:$0xff]   ;;  %v2253_v23 = vld [vmem:[%s2745_s2 + $0x10] sm:$0xff]   ;;  %v2254_v24 = vld [vmem:[%s2745_s2 + $0x8] sm:$0xff]   ;;  %v2416_v32 = vshrl.u32 %v293_v31, 7  ;;  %s2642_s13 = scalar_lea.vmem %s2749_s6, %s1806_s8 }
   0xe   : > { %1992 = vmatprep.subr.bf16.mxu0 %v2231_v1  ;;  %2219 = vmatprep.subr.bf16.mxu1 %v2231_v1  ;;  %v2232_v3 = vld [vmem:[%s2346_s9] sm:$0xff]   ;;  %v2233_v4 = vld [vmem:[%s2346_s9 + $0x8] sm:$0xff]   ;;  %v2234_v5 = vld [vmem:[%s2346_s9 + $0x10] sm:$0xff]  }
   0xf   : > { %1994 = vmatprep.mubr.msk.bf16.mxu0 %vm389_vm0, %v2232_v3  ;;  %v2235_v6 = vld [vmem:[%s2346_s9 + $0x18] sm:$0xff]   ;;  %v2236_v7 = vld [vmem:[%s2346_s9 + $0x20] sm:$0xff]   ;;  %v2241_v10 = vld [vmem:[%s2346_s9 + $0x48] sm:$0xff]   ;;  %v295_v33 = vsub.s32 0, %v2416_v32 }
  0x10   : > { %v2240_v8 = vld [vmem:[%s2346_s9 + $0x40] sm:$0xff]   ;;  %v2242_v11 = vld [vmem:[%s2346_s9 + $0x50] sm:$0xff]   ;;  %v2237_v13 = vld [vmem:[%s2346_s9 + $0x28] sm:$0xff]  }
  0x11   : > { %1993 = vmatpush3.bf16.msra.mxu0 %v2231_v1  ;;  %2221 = vmatpush3.bf16.msra.mxu1 %v2231_v1  ;;  %v2238_v14 = vld [vmem:[%s2346_s9 + $0x30] sm:$0xff]   ;;  %v2243_v15 = vld [vmem:[%s2346_s9 + $0x58] sm:$0xff]   ;;  %v2244_v16 = vld [vmem:[%s2346_s9 + $0x60] sm:$0xff]  }
  0x12   : > { %2026 = vmatprep.subr.bf16.mxu1 %v2248_v2  ;;  %2010 = vmatprep.mubr.msk.bf16.mxu1 %vm389_vm0, %v2240_v8  ;;  %v2239_v19 = vld [vmem:[%s2346_s9 + $0x38] sm:$0xff]   ;;  %v2245_v20 = vld [vmem:[%s2346_s9 + $0x68] sm:$0xff]   ;;  %v2246_v21 = vld [vmem:[%s2346_s9 + $0x70] sm:$0xff]  }
  0x13   : > { %v2247_v22 = vld [vmem:[%s2346_s9 + $0x78] sm:$0xff]   ;;  %v2255_v25 = vld [vmem:[%s2745_s2] sm:$0xff]   ;;  %v2257_v27 = vld [vmem:[%s2745_s2 + $0x70] sm:$0xff]  }
  0x14   : > { %1995 = vmatmul.mubr.msk.bf16.vlgmr.msra.gmra.mxu0 %vm389_vm0, %v2233_v4  ;;  %2011 = vmatmul.mubr.msk.bf16.vlgmr.msra.gmra.mxu1 %vm389_vm0, %v2241_v10  ;;  %v2256_v26 = vld [vmem:[%s2745_s2 + $0x78] sm:$0xff]   ;;  %v2258_v28 = vld [vmem:[%s2745_s2 + $0x68] sm:$0xff]   ;;  %v2259_v29 = vld [vmem:[%s2745_s2 + $0x60] sm:$0xff]  }
  0x15   : > { %1998 = vmatprep.mubr.msk.bf16.mxu0 %vm389_vm0, %v2234_v5  ;;  %2014 = vmatprep.mubr.msk.bf16.mxu1 %vm389_vm0, %v2242_v11  ;;  %v2260_v30 = vld [vmem:[%s2745_s2 + $0x58] sm:$0xff]   ;;  %v2422_v34 = vld [vmem:[%s2746_s3] sm:$0xff] }
  0x16   : > { %2027 = vmatpush3.bf16.msra.mxu1 %v2248_v2  ;;  %2074 = vmatprep.subr.bf16.mxu0 %v2256_v26  ;;  %v2425_v36 = vrot.slane %v2422_v34, %v295_v33 }
  0x17   : > { %2028 = vmatprep.subr.bf16.mxu1 %v2249_v9  ;;  %2075 = vmatpush3.bf16.msra.mxu0 %v2256_v26 }
  0x18   : > { %2076 = vmatprep.subr.bf16.mxu0 %v2257_v27 }
  0x1a   : > { %2029 = vmatpush3.bf16.msra.mxu1 %v2249_v9 }
  0x1b   : > { %2030 = vmatprep.subr.bf16.mxu1 %v2250_v12  ;;  %2077 = vmatpush3.bf16.msra.mxu0 %v2257_v27 }
  0x1c   : > { %1999 = vmatmul.mubr.msk.bf16.gmra.mxu0 %vm389_vm0, %v2235_v6  ;;  %2015 = vmatmul.mubr.msk.bf16.gmra.mxu1 %vm389_vm0, %v2243_v15 }
  0x1d   : > { %2002 = vmatprep.mubr.msk.bf16.mxu0 %vm389_vm0, %v2236_v7  ;;  %2018 = vmatprep.mubr.msk.bf16.mxu1 %vm389_vm0, %v2244_v16 }
  0x1e   : > { %2031 = vmatpush3.bf16.msra.mxu1 %v2250_v12  ;;  %2078 = vmatprep.subr.bf16.mxu0 %v2258_v28 }
  0x1f   : > { %2032 = vmatprep.subr.bf16.mxu1 %v2251_v17  ;;  %2079 = vmatpush3.bf16.msra.mxu0 %v2258_v28 }
  0x20   : > { %2080 = vmatprep.subr.bf16.mxu0 %v2259_v29 }
  0x22   : > { %2033 = vmatpush3.bf16.msra.mxu1 %v2251_v17 }
  0x23   : > { %2034 = vmatprep.subr.bf16.mxu1 %v2252_v18  ;;  %2081 = vmatpush3.bf16.msra.mxu0 %v2259_v29 }
  0x24   : > { %2003 = vmatmul.mubr.msk.bf16.gmra.mxu0 %vm389_vm0, %v2237_v13  ;;  %2019 = vmatmul.mubr.msk.bf16.gmra.mxu1 %vm389_vm0, %v2245_v20 }
  0x25   : > { %2006 = vmatprep.mubr.msk.bf16.mxu0 %vm389_vm0, %v2238_v14  ;;  %2022 = vmatprep.mubr.msk.bf16.mxu1 %vm389_vm0, %v2246_v21 }
  0x26   : > { %2035 = vmatpush3.bf16.msra.mxu1 %v2252_v18  ;;  %2082 = vmatprep.subr.bf16.mxu0 %v2260_v30 }
  0x27   : > { %2036 = vmatprep.subr.bf16.mxu1 %v2253_v23  ;;  %2083 = vmatpush3.bf16.msra.mxu0 %v2260_v30 }
  0x2a   : > { %2037 = vmatpush3.bf16.msra.mxu1 %v2253_v23 }
  0x2b   : > { %2038 = vmatprep.subr.bf16.mxu1 %v2254_v24 }
  0x2c   : > { %2007 = vmatmul.mubr.msk.bf16.gmra.mxu0 %vm389_vm0, %v2239_v19  ;;  %2023 = vmatmul.mubr.msk.bf16.gmra.mxu1 %vm389_vm0, %v2247_v22 }
  0x2e   : > { %2039 = vmatpush3.bf16.msra.mxu1 %v2254_v24 }
  0x2f   : > { %2040 = vmatprep.subr.bf16.mxu1 %v2255_v25 }
  0x32   : > { %2041 = vmatpush3.bf16.msra.mxu1 %v2255_v25 }
  0xd4   : > { %v1996_v35 = vpop.f32.mrf.mxu0  ;;  %v2431_v46 = vpop.f32.mrf.mxu1 }
  0xd5   : > { %v481_v41 = vadd.f32 %v1996_v35, %v2425_v36 }
  0xd6   : > { %v472_v37 = vpop.f32.mrf.mxu0  ;;  %v536_v51 = vpop.f32.mrf.mxu1 }
  0xd7   : > { %v473_v39 = vadd.f32 %v472_v37, %v2425_v36  ;;  %v601_v49 = vmax.f32 %v481_v41, 0.0  ;;  %v537_v25 = vadd.f32 %v536_v51, %v2425_v36 }
  0xd8   : > { %v1997_v38 = vpop.f32.mrf.mxu0  ;;  %v2433_v55 = vpop.f32.mrf.mxu1 }
  0xd9   : > { %v484_v40 = vadd.f32 %v1997_v38, %v2425_v36  ;;  %v599_v47 = vmax.f32 %v473_v39, 0.0  ;;  %v615_v37 = vmax.f32 %v537_v25, 0.0  ;;  %v2264_v25 = vld [vmem:[%s2745_s2 + $0xb8] sm:$0xff]  }
  0xda   : > { %v475_v42 = vpop.f32.mrf.mxu0  ;;  %v539_v60 = vpop.f32.mrf.mxu1  ;;  %2122 = vmatprep.subr.bf16.mxu1 %v2264_v25 }
  0xdb   : > { %v476_v43 = vadd.f32 %v475_v42, %v2425_v36  ;;  %v602_v44 = vmax.f32 %v484_v40, 0.0  ;;  %v540_v26 = vadd.f32 %v539_v60, %v2425_v36 }
  0xdc   : > { %v2000_v45 = vpop.f32.mrf.mxu0  ;;  %v2439_v0 = vpop.f32.mrf.mxu1 }
  0xdd   : > { %v600_v48 = vmax.f32 %v476_v43, 0.0  ;;  %v632_v53 = vpack.c.bf16 %v602_v44, %v601_v49  ;;  %v497_v58 = vadd.f32 %v2000_v45, %v2425_v36  ;;  %v616_v39 = vmax.f32 %v540_v26, 0.0  ;;  %v2265_v26 = vld [vmem:[%s2745_s2 + $0xb0] sm:$0xff]  }
  0xde   : > { %v488_v50 = vpop.f32.mrf.mxu0  ;;  %v552_v5 = vpop.f32.mrf.mxu1 }
  0xdf   : > { %v631_v52 = vpack.c.bf16 %v600_v48, %v599_v47  ;;  %v489_v56 = vadd.f32 %v488_v50, %v2425_v36  ;;  %v605_v3 = vmax.f32 %v497_v58, 0.0  ;;  %v639_v47 = vpack.c.bf16 %v616_v39, %v615_v37 }
  0xe0   : > { %v2001_v54 = vpop.f32.mrf.mxu0  ;;  %v2017_v9 = vpop.f32.mrf.mxu1  ;;  %v553_v48 = vadd.f32 %v552_v5, %v2425_v36  ;;  %v545_v50 = vadd.f32 %v2431_v46, %v2425_v36  ;;  %v561_v46 = vadd.f32 %v2439_v0, %v2425_v36 }
  0xe1   : > { %v500_v57 = vadd.f32 %v2001_v54, %v2425_v36  ;;  %2042 = vmatprep.mubr.bf16.mxu1 %v631_v52  ;;  %v603_v1 = vmax.f32 %v489_v56, 0.0  ;;  %v548_v52 = vadd.f32 %v2433_v55, %v2425_v36  ;;  %v564_v55 = vadd.f32 %v2017_v9, %v2425_v36 }
  0xe2   : > { %v491_v59 = vpop.f32.mrf.mxu0  ;;  %2043 = vmatmul.mubr.bf16.vlgmr.msra.gmra.mxu1 %v632_v53  ;;  %v555_v14 = vpop.f32.mrf.mxu1  ;;  %v619_v54 = vmax.f32 %v553_v48, 0.0 }
  0xe3   : > { %v492_v61 = vadd.f32 %v491_v59, %v2425_v36  ;;  %v606_v62 = vmax.f32 %v500_v57, 0.0  ;;  %v556_v49 = vadd.f32 %v555_v14, %v2425_v36  ;;  %v617_v57 = vmax.f32 %v545_v50, 0.0  ;;  %2123 = vmatpush3.bf16.msra.mxu1 %v2264_v25 }
  0xe4   : > { %v2004_v63 = vpop.f32.mrf.mxu0  ;;  %v2020_v18 = vpop.f32.mrf.mxu1  ;;  %v618_v58 = vmax.f32 %v548_v52, 0.0  ;;  %v622_v5 = vmax.f32 %v564_v55, 0.0  ;;  %2124 = vmatprep.subr.bf16.mxu1 %v2265_v26 }
  0xe5   : > { %v604_v2 = vmax.f32 %v492_v61, 0.0  ;;  %v634_v7 = vpack.c.bf16 %v606_v62, %v605_v3  ;;  %v513_v12 = vadd.f32 %v2004_v63, %v2425_v36  ;;  %v620_v56 = vmax.f32 %v556_v49, 0.0 }
  0xe6   : > { %v504_v4 = vpop.f32.mrf.mxu0  ;;  %v568_v23 = vpop.f32.mrf.mxu1  ;;  %v640_v63 = vpack.c.bf16 %v618_v58, %v617_v57 }
  0xe7   : > { %v633_v6 = vpack.c.bf16 %v604_v2, %v603_v1  ;;  %v505_v10 = vadd.f32 %v504_v4, %v2425_v36  ;;  %v609_v21 = vmax.f32 %v513_v12, 0.0  ;;  %v641_v60 = vpack.c.bf16 %v620_v56, %v619_v54  ;;  %2125 = vmatpush3.bf16.msra.mxu1 %v2265_v26 }
  0xe8   : > { %v2005_v8 = vpop.f32.mrf.mxu0  ;;  %v2021_v29 = vpop.f32.mrf.mxu1  ;;  %v569_v61 = vadd.f32 %v568_v23, %v2425_v36  ;;  %v621_v4 = vmax.f32 %v561_v46, 0.0  ;;  %v577_v12 = vadd.f32 %v2020_v18, %v2425_v36  ;;  %v2261_v18 = vld [vmem:[%s2745_s2 + $0x50] sm:$0xff]  }
  0xe9   : > { %v516_v11 = vadd.f32 %v2005_v8, %v2425_v36  ;;  %2046 = vmatprep.mubr.bf16.mxu1 %v633_v6  ;;  %v607_v19 = vmax.f32 %v505_v10, 0.0  ;;  %v580_v0 = vadd.f32 %v2021_v29, %v2425_v36  ;;  %2084 = vmatprep.subr.bf16.mxu0 %v2261_v18  ;;  %v2268_v29 = vld [vmem:[%s2745_s2 + $0x98] sm:$0xff]  }
  0xea   : > { %v507_v13 = vpop.f32.mrf.mxu0  ;;  %2047 = vmatmul.mubr.bf16.gmra.mxu1 %v634_v7  ;;  %v571_v41 = vpop.f32.mrf.mxu1  ;;  %v623_v2 = vmax.f32 %v569_v61, 0.0  ;;  %v625_v14 = vmax.f32 %v577_v12, 0.0  ;;  %2085 = vmatpush3.bf16.msra.mxu0 %v2261_v18 }
  0xeb   : > { %v508_v15 = vadd.f32 %v507_v13, %v2425_v36  ;;  %v610_v16 = vmax.f32 %v516_v11, 0.0  ;;  %v572_v62 = vadd.f32 %v571_v41, %v2425_v36  ;;  %v642_v11 = vpack.c.bf16 %v622_v5, %v621_v4 }
  0xec   : > { %v2008_v17 = vpop.f32.mrf.mxu0  ;;  %v2024_v53 = vpop.f32.mrf.mxu1 }
  0xed   : > { %v608_v20 = vmax.f32 %v508_v15, 0.0  ;;  %v636_v27 = vpack.c.bf16 %v610_v16, %v609_v21  ;;  %v529_v33 = vadd.f32 %v2008_v17, %v2425_v36  ;;  %v624_v3 = vmax.f32 %v572_v62, 0.0 }
  0xee   : > { %v520_v22 = vpop.f32.mrf.mxu0  ;;  %v584_v59 = vpop.f32.mrf.mxu1  ;;  %v626_v15 = vmax.f32 %v580_v0, 0.0 }
  0xef   : > { %v635_v24 = vpack.c.bf16 %v608_v20, %v607_v19  ;;  %v521_v30 = vadd.f32 %v520_v22, %v2425_v36  ;;  %v613_v44 = vmax.f32 %v529_v33, 0.0  ;;  %v643_v7 = vpack.c.bf16 %v624_v3, %v623_v2 }
  0xf0   : > { %v2009_v28 = vpop.f32.mrf.mxu0  ;;  %v2025_v1 = vpop.f32.mrf.mxu1  ;;  %v585_v8 = vadd.f32 %v584_v59, %v2425_v36  ;;  %v644_v17 = vpack.c.bf16 %v626_v15, %v625_v14  ;;  %v593_v19 = vadd.f32 %v2024_v53, %v2425_v36  ;;  %v665_v33 = vsub.s32 1, %v2416_v32 }
  0xf1   : > { %v532_v31 = vadd.f32 %v2009_v28, %v2425_v36  ;;  %2050 = vmatprep.mubr.bf16.mxu1 %v635_v24  ;;  %v611_v42 = vmax.f32 %v521_v30, 0.0  ;;  %v596_v20 = vadd.f32 %v2025_v1, %v2425_v36  ;;  %v2262_v24 = vld [vmem:[%s2745_s2 + $0x48] sm:$0xff]   ;;  %v2267_v28 = vld [vmem:[%s2745_s2 + $0xa0] sm:$0xff]   ;;  %v2269_v30 = vld [vmem:[%s2745_s2 + $0x90] sm:$0xff]  }
  0xf2   : > { %v523_v35 = vpop.f32.mrf.mxu0  ;;  %2051 = vmatmul.mubr.bf16.gmra.mxu1 %v636_v27  ;;  %v587_v6 = vpop.f32.mrf.mxu1  ;;  %v627_v9 = vmax.f32 %v585_v8, 0.0  ;;  %v629_v21 = vmax.f32 %v593_v19, 0.0  ;;  %2086 = vmatprep.subr.bf16.mxu0 %v2262_v24  ;;  %v2266_v27 = vld [vmem:[%s2745_s2 + $0xa8] sm:$0xff]   ;;  %v2500_v37 = vrot.slane %v2422_v34, %v665_v33 }
  0xf3   : > { %v524_v38 = vadd.f32 %v523_v35, %v2425_v36  ;;  %v614_v40 = vmax.f32 %v532_v31, 0.0  ;;  %v588_v10 = vadd.f32 %v587_v6, %v2425_v36  ;;  %v630_v22 = vmax.f32 %v596_v20, 0.0  ;;  %2087 = vmatpush3.bf16.msra.mxu0 %v2262_v24  ;;  %v2263_v36 = vld [vmem:[%s2745_s2 + $0x40] sm:$0xff]   ;;  %2126 = vmatprep.subr.bf16.mxu1 %v2266_v27  ;;  %v2270_v31 = vld [vmem:[%s2745_s2 + $0x88] sm:$0xff]  }
  0xf4   : > { %2088 = vmatprep.subr.bf16.mxu0 %v2263_v36  ;;  %2127 = vmatpush3.bf16.msra.mxu1 %v2266_v27 }
  0xf5   : > { %v612_v43 = vmax.f32 %v524_v38, 0.0  ;;  %v638_v51 = vpack.c.bf16 %v614_v40, %v613_v44  ;;  %v628_v13 = vmax.f32 %v588_v10, 0.0  ;;  %v646_v23 = vpack.c.bf16 %v630_v22, %v629_v21  ;;  %2128 = vmatprep.subr.bf16.mxu1 %v2267_v28 }
  0xf7   : > { %v637_v45 = vpack.c.bf16 %v612_v43, %v611_v42  ;;  %v645_v16 = vpack.c.bf16 %v628_v13, %v627_v9  ;;  %2089 = vmatpush3.bf16.msra.mxu0 %v2263_v36 }
  0xf8   : > { %2129 = vmatpush3.bf16.msra.mxu1 %v2267_v28 }
  0xf9   : > { %2054 = vmatprep.mubr.bf16.mxu1 %v637_v45  ;;  %2130 = vmatprep.subr.bf16.mxu1 %v2268_v29 }
  0xfa   : > { %2055 = vmatmul.mubr.bf16.gmra.mxu1 %v638_v51 }
  0xfb   : > { %2058 = vmatprep.mubr.bf16.mxu1 %v639_v47 }
  0xfc   : > { %2131 = vmatpush3.bf16.msra.mxu1 %v2268_v29 }
  0xfd   : > { %2132 = vmatprep.subr.bf16.mxu1 %v2269_v30 }
 0x100   : > { %2133 = vmatpush3.bf16.msra.mxu1 %v2269_v30 }
 0x101   : > { %2134 = vmatprep.subr.bf16.mxu1 %v2270_v31 }
 0x102   : > { %2059 = vmatmul.mubr.bf16.gmra.mxu1 %v640_v63 }
 0x103   : > { %2062 = vmatprep.mubr.bf16.mxu1 %v641_v60 }
 0x104   : > { %2135 = vmatpush3.bf16.msra.mxu1 %v2270_v31 }
 0x10a   : > { %2063 = vmatmul.mubr.bf16.gmra.mxu1 %v642_v11 }
 0x10b   : > { %2066 = vmatprep.mubr.bf16.mxu1 %v643_v7 }
 0x112   : > { %2067 = vmatmul.mubr.bf16.gmra.mxu1 %v644_v17 }
 0x113   : > { %2070 = vmatprep.mubr.bf16.mxu1 %v645_v16 }
 0x11a   : > { %2071 = vmatmul.mubr.bf16.gmra.mxu1 %v646_v23 }
 0x1a2   : > { %v2044_v35 = vpop.f32.mrf.mxu1 }
 0x1a3   : > { %v758_v42 = vadd.f32 %v2044_v35, %v2500_v37 }
 0x1a4   : > { %v749_v38 = vpop.f32.mrf.mxu1 }
 0x1a5   : > { %v750_v40 = vadd.f32 %v749_v38, %v2500_v37  ;;  %v878_v50 = vmax.f32 %v758_v42, 0.0 }
 0x1a6   : > { %v2045_v39 = vpop.f32.mrf.mxu1 }
 0x1a7   : > { %v761_v41 = vadd.f32 %v2045_v39, %v2500_v37  ;;  %v876_v48 = vmax.f32 %v750_v40, 0.0 }
 0x1a8   : > { %v752_v43 = vpop.f32.mrf.mxu1 }
 0x1a9   : > { %v753_v44 = vadd.f32 %v752_v43, %v2500_v37  ;;  %v879_v45 = vmax.f32 %v761_v41, 0.0 }
 0x1aa   : > { %v2048_v47 = vpop.f32.mrf.mxu1 }
 0x1ab   : > { %v877_v49 = vmax.f32 %v753_v44, 0.0  ;;  %v909_v53 = vpack.c.bf16 %v879_v45, %v878_v50  ;;  %v774_v58 = vadd.f32 %v2048_v47, %v2500_v37 }
 0x1ac   : > { %v765_v51 = vpop.f32.mrf.mxu1 }
 0x1ad   : > { %v908_v52 = vpack.c.bf16 %v877_v49, %v876_v48  ;;  %v766_v56 = vadd.f32 %v765_v51, %v2500_v37  ;;  %v882_v55 = vmax.f32 %v774_v58, 0.0 }
 0x1ae   : > { %v2049_v54 = vpop.f32.mrf.mxu1 }
 0x1af   : > { %v777_v57 = vadd.f32 %v2049_v54, %v2500_v37  ;;  %2090 = vmatprep.mubr.bf16.mxu0 %v908_v52  ;;  %v880_v63 = vmax.f32 %v766_v56, 0.0 }
 0x1b0   : > { %v768_v59 = vpop.f32.mrf.mxu1  ;;  %2091 = vmatmul.mubr.bf16.vlgmr.msra.gmra.mxu0 %v909_v53 }
 0x1b1   : > { %v769_v60 = vadd.f32 %v768_v59, %v2500_v37  ;;  %v883_v61 = vmax.f32 %v777_v57, 0.0 }
 0x1b2   : > { %v2052_v62 = vpop.f32.mrf.mxu1 }
 0x1b3   : > { %v881_v46 = vmax.f32 %v769_v60, 0.0  ;;  %v911_v3 = vpack.c.bf16 %v883_v61, %v882_v55  ;;  %v790_v7 = vadd.f32 %v2052_v62, %v2500_v37 }
 0x1b4   : > { %v781_v1 = vpop.f32.mrf.mxu1 }
 0x1b5   : > { %v910_v2 = vpack.c.bf16 %v881_v46, %v880_v63  ;;  %v782_v5 = vadd.f32 %v781_v1, %v2500_v37  ;;  %v886_v13 = vmax.f32 %v790_v7, 0.0 }
 0x1b6   : > { %v2053_v4 = vpop.f32.mrf.mxu1 }
 0x1b7   : > { %v793_v6 = vadd.f32 %v2053_v4, %v2500_v37  ;;  %2094 = vmatprep.mubr.bf16.mxu0 %v910_v2  ;;  %v884_v0 = vmax.f32 %v782_v5, 0.0 }
 0x1b8   : > { %v784_v8 = vpop.f32.mrf.mxu1  ;;  %2095 = vmatmul.mubr.bf16.gmra.mxu0 %v911_v3 }
 0x1b9   : > { %v785_v10 = vadd.f32 %v784_v8, %v2500_v37  ;;  %v887_v11 = vmax.f32 %v793_v6, 0.0 }
 0x1ba   : > { %v2056_v12 = vpop.f32.mrf.mxu1 }
 0x1bb   : > { %v885_v9 = vmax.f32 %v785_v10, 0.0  ;;  %v913_v16 = vpack.c.bf16 %v887_v11, %v886_v13  ;;  %v806_v21 = vadd.f32 %v2056_v12, %v2500_v37 }
 0x1bc   : > { %v797_v14 = vpop.f32.mrf.mxu1 }
 0x1bd   : > { %v912_v15 = vpack.c.bf16 %v885_v9, %v884_v0  ;;  %v798_v19 = vadd.f32 %v797_v14, %v2500_v37  ;;  %v890_v26 = vmax.f32 %v806_v21, 0.0 }
 0x1be   : > { %v2057_v17 = vpop.f32.mrf.mxu1 }
 0x1bf   : > { %v809_v20 = vadd.f32 %v2057_v17, %v2500_v37  ;;  %2098 = vmatprep.mubr.bf16.mxu0 %v912_v15  ;;  %v888_v36 = vmax.f32 %v798_v19, 0.0 }
 0x1c0   : > { %v800_v22 = vpop.f32.mrf.mxu1  ;;  %2099 = vmatmul.mubr.bf16.gmra.mxu0 %v913_v16 }
 0x1c1   : > { %v801_v23 = vadd.f32 %v800_v22, %v2500_v37  ;;  %v891_v18 = vmax.f32 %v809_v20, 0.0 }
 0x1c2   : > { %v2060_v24 = vpop.f32.mrf.mxu1 }
 0x1c3   : > { %v889_v25 = vmax.f32 %v801_v23, 0.0  ;;  %v915_v29 = vpack.c.bf16 %v891_v18, %v890_v26  ;;  %v822_v35 = vadd.f32 %v2060_v24, %v2500_v37  ;;  %v2271_v24 = vld [vmem:[%s2745_s2 + $0x80] sm:$0xff]  }
 0x1c4   : > { %v813_v27 = vpop.f32.mrf.mxu1  ;;  %2136 = vmatprep.subr.bf16.mxu1 %v2271_v24  ;;  %v2275_v26 = vld [vmem:[%s2747_s4 + $0x20] sm:$0xff]  }
 0x1c5   : > { %v914_v28 = vpack.c.bf16 %v889_v25, %v888_v36  ;;  %v814_v31 = vadd.f32 %v813_v27, %v2500_v37  ;;  %v894_v44 = vmax.f32 %v822_v35, 0.0  ;;  %2137 = vmatpush3.bf16.msra.mxu1 %v2271_v24  ;;  %v2272_v36 = vld [vmem:[%s2747_s4 + $0x38] sm:$0xff]   ;;  %v2274_v25 = vld [vmem:[%s2747_s4 + $0x28] sm:$0xff]  }
 0x1c6   : > { %v2061_v30 = vpop.f32.mrf.mxu1  ;;  %2170 = vmatprep.subr.bf16.mxu0 %v2272_v36  ;;  %v2276_v27 = vld [vmem:[%s2747_s4 + $0x18] sm:$0xff]  }
 0x1c7   : > { %v825_v33 = vadd.f32 %v2061_v30, %v2500_v37  ;;  %2102 = vmatprep.mubr.bf16.mxu0 %v914_v28  ;;  %v892_v42 = vmax.f32 %v814_v31, 0.0  ;;  %2171 = vmatpush3.bf16.msra.mxu0 %v2272_v36  ;;  %v2277_v28 = vld [vmem:[%s2747_s4 + $0x10] sm:$0xff]   ;;  %v942_v30 = vsub.s32 2, %v2416_v32 }
 0x1c8   : > { %v816_v38 = vpop.f32.mrf.mxu1  ;;  %2103 = vmatmul.mubr.bf16.gmra.mxu0 %v915_v29  ;;  %v2278_v29 = vld [vmem:[%s2747_s4 + $0x8] sm:$0xff]  }
 0x1c9   : > { %v817_v39 = vadd.f32 %v816_v38, %v2500_v37  ;;  %v895_v40 = vmax.f32 %v825_v33, 0.0  ;;  %v2560_v33 = vrot.slane %v2422_v34, %v942_v30 }
 0x1ca   : > { %v2064_v41 = vpop.f32.mrf.mxu1 }
 0x1cb   : > { %v893_v43 = vmax.f32 %v817_v39, 0.0  ;;  %v917_v48 = vpack.c.bf16 %v895_v40, %v894_v44  ;;  %v838_v52 = vadd.f32 %v2064_v41, %v2500_v37 }
 0x1cc   : > { %v829_v45 = vpop.f32.mrf.mxu1 }
 0x1cd   : > { %v916_v47 = vpack.c.bf16 %v893_v43, %v892_v42  ;;  %v830_v50 = vadd.f32 %v829_v45, %v2500_v37  ;;  %v898_v60 = vmax.f32 %v838_v52, 0.0 }
 0x1ce   : > { %v2065_v49 = vpop.f32.mrf.mxu1 }
 0x1cf   : > { %v841_v51 = vadd.f32 %v2065_v49, %v2500_v37  ;;  %2106 = vmatprep.mubr.bf16.mxu0 %v916_v47  ;;  %v896_v58 = vmax.f32 %v830_v50, 0.0 }
 0x1d0   : > { %v832_v53 = vpop.f32.mrf.mxu1  ;;  %2107 = vmatmul.mubr.bf16.gmra.mxu0 %v917_v48 }
 0x1d1   : > { %v833_v54 = vadd.f32 %v832_v53, %v2500_v37  ;;  %v899_v56 = vmax.f32 %v841_v51, 0.0 }
 0x1d2   : > { %v2068_v57 = vpop.f32.mrf.mxu1 }
 0x1d3   : > { %v897_v59 = vmax.f32 %v833_v54, 0.0  ;;  %v919_v63 = vpack.c.bf16 %v899_v56, %v898_v60  ;;  %v854_v2 = vadd.f32 %v2068_v57, %v2500_v37 }
 0x1d4   : > { %v845_v61 = vpop.f32.mrf.mxu1 }
 0x1d5   : > { %v918_v62 = vpack.c.bf16 %v897_v59, %v896_v58  ;;  %v846_v55 = vadd.f32 %v845_v61, %v2500_v37  ;;  %v902_v10 = vmax.f32 %v854_v2, 0.0 }
 0x1d6   : > { %v2069_v46 = vpop.f32.mrf.mxu1 }
 0x1d7   : > { %v857_v1 = vadd.f32 %v2069_v46, %v2500_v37  ;;  %2110 = vmatprep.mubr.bf16.mxu0 %v918_v62  ;;  %v900_v7 = vmax.f32 %v846_v55, 0.0 }
 0x1d8   : > { %v848_v3 = vpop.f32.mrf.mxu1  ;;  %2111 = vmatmul.mubr.bf16.gmra.mxu0 %v919_v63 }
 0x1d9   : > { %v849_v4 = vadd.f32 %v848_v3, %v2500_v37  ;;  %v903_v5 = vmax.f32 %v857_v1, 0.0 }
 0x1da   : > { %v2072_v6 = vpop.f32.mrf.mxu1 }
 0x1db   : > { %v901_v8 = vmax.f32 %v849_v4, 0.0  ;;  %v921_v0 = vpack.c.bf16 %v903_v5, %v902_v10  ;;  %v870_v15 = vadd.f32 %v2072_v6, %v2500_v37 }
 0x1dc   : > { %v861_v11 = vpop.f32.mrf.mxu1 }
 0x1dd   : > { %v920_v12 = vpack.c.bf16 %v901_v8, %v900_v7  ;;  %v862_v13 = vadd.f32 %v861_v11, %v2500_v37  ;;  %v906_v22 = vmax.f32 %v870_v15, 0.0 }
 0x1de   : > { %v2073_v9 = vpop.f32.mrf.mxu1 }
 0x1df   : > { %v873_v14 = vadd.f32 %v2073_v9, %v2500_v37  ;;  %2114 = vmatprep.mubr.bf16.mxu0 %v920_v12  ;;  %v904_v20 = vmax.f32 %v862_v13, 0.0 }
 0x1e0   : > { %v864_v16 = vpop.f32.mrf.mxu1  ;;  %2115 = vmatmul.mubr.bf16.gmra.mxu0 %v921_v0 }
 0x1e1   : > { %v865_v17 = vadd.f32 %v864_v16, %v2500_v37  ;;  %v907_v19 = vmax.f32 %v873_v14, 0.0  ;;  %v2273_v37 = vld [vmem:[%s2747_s4 + $0x30] sm:$0xff]  }
 0x1e2   : > { %2172 = vmatprep.subr.bf16.mxu0 %v2273_v37 }
 0x1e3   : > { %v905_v21 = vmax.f32 %v865_v17, 0.0  ;;  %v923_v18 = vpack.c.bf16 %v907_v19, %v906_v22  ;;  %2173 = vmatpush3.bf16.msra.mxu0 %v2273_v37 }
 0x1e4   : > { %2174 = vmatprep.subr.bf16.mxu0 %v2274_v25 }
 0x1e5   : > { %v922_v23 = vpack.c.bf16 %v905_v21, %v904_v20 }
 0x1e7   : > { %2118 = vmatprep.mubr.bf16.mxu0 %v922_v23  ;;  %2175 = vmatpush3.bf16.msra.mxu0 %v2274_v25 }
 0x1e8   : > { %2119 = vmatmul.mubr.bf16.gmra.mxu0 %v923_v18  ;;  %2176 = vmatprep.subr.bf16.mxu0 %v2275_v26 }
 0x1eb   : > { %2177 = vmatpush3.bf16.msra.mxu0 %v2275_v26 }
 0x1ec   : > { %2178 = vmatprep.subr.bf16.mxu0 %v2276_v27 }
 0x1ef   : > { %2179 = vmatpush3.bf16.msra.mxu0 %v2276_v27 }
 0x1f0   : > { %2180 = vmatprep.subr.bf16.mxu0 %v2277_v28 }
 0x1f3   : > { %2181 = vmatpush3.bf16.msra.mxu0 %v2277_v28 }
 0x1f4   : > { %2182 = vmatprep.subr.bf16.mxu0 %v2278_v29 }
 0x1f7   : > { %2183 = vmatpush3.bf16.msra.mxu0 %v2278_v29 }
 0x270   : > { %v2092_v31 = vpop.f32.mrf.mxu0 }
 0x271   : > { %v1035_v41 = vadd.f32 %v2092_v31, %v2560_v33 }
 0x272   : > { %v1026_v35 = vpop.f32.mrf.mxu0 }
 0x273   : > { %v1027_v39 = vadd.f32 %v1026_v35, %v2560_v33  ;;  %v1155_v49 = vmax.f32 %v1035_v41, 0.0 }
 0x274   : > { %v2093_v38 = vpop.f32.mrf.mxu0 }
 0x275   : > { %v1038_v40 = vadd.f32 %v2093_v38, %v2560_v33  ;;  %v1153_v47 = vmax.f32 %v1027_v39, 0.0 }
 0x276   : > { %v1029_v42 = vpop.f32.mrf.mxu0 }
 0x277   : > { %v1030_v43 = vadd.f32 %v1029_v42, %v2560_v33  ;;  %v1156_v44 = vmax.f32 %v1038_v40, 0.0 }
 0x278   : > { %v2096_v45 = vpop.f32.mrf.mxu0 }
 0x279   : > { %v1154_v48 = vmax.f32 %v1030_v43, 0.0  ;;  %v1186_v52 = vpack.c.bf16 %v1156_v44, %v1155_v49  ;;  %v1051_v57 = vadd.f32 %v2096_v45, %v2560_v33 }
 0x27a   : > { %v1042_v50 = vpop.f32.mrf.mxu0 }
 0x27b   : > { %v1185_v51 = vpack.c.bf16 %v1154_v48, %v1153_v47  ;;  %v1043_v54 = vadd.f32 %v1042_v50, %v2560_v33  ;;  %v1159_v46 = vmax.f32 %v1051_v57, 0.0 }
 0x27c   : > { %v2097_v53 = vpop.f32.mrf.mxu0 }
 0x27d   : > { %v1054_v56 = vadd.f32 %v2097_v53, %v2560_v33  ;;  %2138 = vmatprep.mubr.bf16.mxu1 %v1185_v51  ;;  %v1157_v62 = vmax.f32 %v1043_v54, 0.0 }
 0x27e   : > { %v1045_v58 = vpop.f32.mrf.mxu0  ;;  %2139 = vmatmul.mubr.bf16.vlgmr.msra.gmra.mxu1 %v1186_v52 }
 0x27f   : > { %v1046_v59 = vadd.f32 %v1045_v58, %v2560_v33  ;;  %v1160_v60 = vmax.f32 %v1054_v56, 0.0 }
 0x280   : > { %v2100_v61 = vpop.f32.mrf.mxu0 }
 0x281   : > { %v1158_v63 = vmax.f32 %v1046_v59, 0.0  ;;  %v1188_v2 = vpack.c.bf16 %v1160_v60, %v1159_v46  ;;  %v1067_v6 = vadd.f32 %v2100_v61, %v2560_v33 }
 0x282   : > { %v1058_v55 = vpop.f32.mrf.mxu0 }
 0x283   : > { %v1187_v1 = vpack.c.bf16 %v1158_v63, %v1157_v62  ;;  %v1059_v4 = vadd.f32 %v1058_v55, %v2560_v33  ;;  %v1163_v9 = vmax.f32 %v1067_v6, 0.0 }
 0x284   : > { %v2101_v3 = vpop.f32.mrf.mxu0 }
 0x285   : > { %v1070_v5 = vadd.f32 %v2101_v3, %v2560_v33  ;;  %2142 = vmatprep.mubr.bf16.mxu1 %v1187_v1  ;;  %v1161_v12 = vmax.f32 %v1059_v4, 0.0 }
 0x286   : > { %v1061_v7 = vpop.f32.mrf.mxu0  ;;  %2143 = vmatmul.mubr.bf16.gmra.mxu1 %v1188_v2 }
 0x287   : > { %v1062_v8 = vadd.f32 %v1061_v7, %v2560_v33  ;;  %v1164_v10 = vmax.f32 %v1070_v5, 0.0 }
 0x288   : > { %v2104_v11 = vpop.f32.mrf.mxu0 }
 0x289   : > { %v1162_v0 = vmax.f32 %v1062_v8, 0.0  ;;  %v1190_v15 = vpack.c.bf16 %v1164_v10, %v1163_v9  ;;  %v1083_v20 = vadd.f32 %v2104_v11, %v2560_v33 }
 0x28a   : > { %v1074_v13 = vpop.f32.mrf.mxu0 }
 0x28b   : > { %v1189_v14 = vpack.c.bf16 %v1162_v0, %v1161_v12  ;;  %v1075_v17 = vadd.f32 %v1074_v13, %v2560_v33  ;;  %v1167_v37 = vmax.f32 %v1083_v20, 0.0 }
 0x28c   : > { %v2105_v16 = vpop.f32.mrf.mxu0 }
 0x28d   : > { %v1086_v19 = vadd.f32 %v2105_v16, %v2560_v33  ;;  %2146 = vmatprep.mubr.bf16.mxu1 %v1189_v14  ;;  %v1165_v24 = vmax.f32 %v1075_v17, 0.0 }
 0x28e   : > { %v1077_v21 = vpop.f32.mrf.mxu0  ;;  %2147 = vmatmul.mubr.bf16.gmra.mxu1 %v1190_v15 }
 0x28f   : > { %v1078_v22 = vadd.f32 %v1077_v21, %v2560_v33  ;;  %v1168_v23 = vmax.f32 %v1086_v19, 0.0 }
 0x290   : > { %v2108_v18 = vpop.f32.mrf.mxu0 }
 0x291   : > { %v1166_v36 = vmax.f32 %v1078_v22, 0.0  ;;  %v1192_v27 = vpack.c.bf16 %v1168_v23, %v1167_v37  ;;  %v1099_v31 = vadd.f32 %v2108_v18, %v2560_v33  ;;  %v2279_v18 = vld [vmem:[%s2747_s4] sm:$0xff]  }
 0x292   : > { %v1090_v25 = vpop.f32.mrf.mxu0  ;;  %2184 = vmatprep.subr.bf16.mxu0 %v2279_v18 }
 0x293   : > { %v1191_v26 = vpack.c.bf16 %v1166_v36, %v1165_v24  ;;  %v1091_v29 = vadd.f32 %v1090_v25, %v2560_v33  ;;  %v1171_v43 = vmax.f32 %v1099_v31, 0.0  ;;  %2185 = vmatpush3.bf16.msra.mxu0 %v2279_v18  ;;  %v1219_v24 = vsub.s32 3, %v2416_v32 }
 0x294   : > { %v2109_v28 = vpop.f32.mrf.mxu0 }
 0x295   : > { %v1102_v30 = vadd.f32 %v2109_v28, %v2560_v33  ;;  %2150 = vmatprep.mubr.bf16.mxu1 %v1191_v26  ;;  %v1169_v41 = vmax.f32 %v1091_v29, 0.0  ;;  %v2599_v37 = vrot.slane %v2422_v34, %v1219_v24 }
 0x296   : > { %v1093_v35 = vpop.f32.mrf.mxu0  ;;  %2151 = vmatmul.mubr.bf16.gmra.mxu1 %v1192_v27 }
 0x297   : > { %v1094_v38 = vadd.f32 %v1093_v35, %v2560_v33  ;;  %v1172_v39 = vmax.f32 %v1102_v30, 0.0 }
 0x298   : > { %v2112_v40 = vpop.f32.mrf.mxu0 }
 0x299   : > { %v1170_v42 = vmax.f32 %v1094_v38, 0.0  ;;  %v1194_v47 = vpack.c.bf16 %v1172_v39, %v1171_v43  ;;  %v1115_v51 = vadd.f32 %v2112_v40, %v2560_v33 }
 0x29a   : > { %v1106_v44 = vpop.f32.mrf.mxu0 }
 0x29b   : > { %v1193_v45 = vpack.c.bf16 %v1170_v42, %v1169_v41  ;;  %v1107_v49 = vadd.f32 %v1106_v44, %v2560_v33  ;;  %v1175_v59 = vmax.f32 %v1115_v51, 0.0 }
 0x29c   : > { %v2113_v48 = vpop.f32.mrf.mxu0 }
 0x29d   : > { %v1118_v50 = vadd.f32 %v2113_v48, %v2560_v33  ;;  %2154 = vmatprep.mubr.bf16.mxu1 %v1193_v45  ;;  %v1173_v57 = vmax.f32 %v1107_v49, 0.0 }
 0x29e   : > { %v1109_v52 = vpop.f32.mrf.mxu0  ;;  %2155 = vmatmul.mubr.bf16.gmra.mxu1 %v1194_v47 }
 0x29f   : > { %v1110_v53 = vadd.f32 %v1109_v52, %v2560_v33  ;;  %v1176_v54 = vmax.f32 %v1118_v50, 0.0 }
 0x2a0   : > { %v2116_v56 = vpop.f32.mrf.mxu0 }
 0x2a1   : > { %v1174_v58 = vmax.f32 %v1110_v53, 0.0  ;;  %v1196_v62 = vpack.c.bf16 %v1176_v54, %v1175_v59  ;;  %v1131_v1 = vadd.f32 %v2116_v56, %v2560_v33 }
 0x2a2   : > { %v1122_v60 = vpop.f32.mrf.mxu0 }
 0x2a3   : > { %v1195_v61 = vpack.c.bf16 %v1174_v58, %v1173_v57  ;;  %v1123_v46 = vadd.f32 %v1122_v60, %v2560_v33  ;;  %v1179_v8 = vmax.f32 %v1131_v1, 0.0 }
 0x2a4   : > { %v2117_v63 = vpop.f32.mrf.mxu0 }
 0x2a5   : > { %v1134_v55 = vadd.f32 %v2117_v63, %v2560_v33  ;;  %2158 = vmatprep.mubr.bf16.mxu1 %v1195_v61  ;;  %v1177_v6 = vmax.f32 %v1123_v46, 0.0 }
 0x2a6   : > { %v1125_v2 = vpop.f32.mrf.mxu0  ;;  %2159 = vmatmul.mubr.bf16.gmra.mxu1 %v1196_v62 }
 0x2a7   : > { %v1126_v3 = vadd.f32 %v1125_v2, %v2560_v33  ;;  %v1180_v4 = vmax.f32 %v1134_v55, 0.0 }
 0x2a8   : > { %v2120_v5 = vpop.f32.mrf.mxu0 }
 0x2a9   : > { %v1178_v7 = vmax.f32 %v1126_v3, 0.0  ;;  %v1198_v12 = vpack.c.bf16 %v1180_v4, %v1179_v8  ;;  %v1147_v14 = vadd.f32 %v2120_v5, %v2560_v33 }
 0x2aa   : > { %v1138_v10 = vpop.f32.mrf.mxu0 }
 0x2ab   : > { %v1197_v11 = vpack.c.bf16 %v1178_v7, %v1177_v6  ;;  %v1139_v9 = vadd.f32 %v1138_v10, %v2560_v33  ;;  %v1183_v21 = vmax.f32 %v1147_v14, 0.0 }
 0x2ac   : > { %v2121_v0 = vpop.f32.mrf.mxu0 }
 0x2ad   : > { %v1150_v13 = vadd.f32 %v2121_v0, %v2560_v33  ;;  %2162 = vmatprep.mubr.bf16.mxu1 %v1197_v11  ;;  %v1181_v19 = vmax.f32 %v1139_v9, 0.0 }
 0x2ae   : > { %v1141_v15 = vpop.f32.mrf.mxu0  ;;  %2163 = vmatmul.mubr.bf16.gmra.mxu1 %v1198_v12 }
 0x2af   : > { %v1142_v16 = vadd.f32 %v1141_v15, %v2560_v33  ;;  %v1184_v17 = vmax.f32 %v1150_v13, 0.0 }
 0x2b1   : > { %v1182_v20 = vmax.f32 %v1142_v16, 0.0  ;;  %v1200_v23 = vpack.c.bf16 %v1184_v17, %v1183_v21 }
 0x2b3   : > { %v1199_v22 = vpack.c.bf16 %v1182_v20, %v1181_v19 }
 0x2b5   : > { %2166 = vmatprep.mubr.bf16.mxu1 %v1199_v22 }
 0x2b6   : > { %2167 = vmatmul.mubr.bf16.gmra.mxu1 %v1200_v23 }
 0x33e   : > { %v2140_v36 = vpop.f32.mrf.mxu1 }
 0x33f   : > { %v1312_v28 = vadd.f32 %v2140_v36, %v2599_v37 }
 0x340   : > { %v1303_v33 = vpop.f32.mrf.mxu1 }
 0x341   : > { %v1304_v26 = vadd.f32 %v1303_v33, %v2599_v37  ;;  %v1432_v32 = vmax.f32 %v1312_v28, 0.0 }
 0x342   : > { %v2141_v25 = vpop.f32.mrf.mxu1 }
 0x343   : > { %v1315_v27 = vadd.f32 %v2141_v25, %v2599_v37  ;;  %v1430_v38 = vmax.f32 %v1304_v26, 0.0 }
 0x344   : > { %v1306_v29 = vpop.f32.mrf.mxu1 }
 0x345   : > { %v1307_v30 = vadd.f32 %v1306_v29, %v2599_v37  ;;  %v1433_v31 = vmax.f32 %v1315_v27, 0.0 }
 0x346   : > { %v2144_v35 = vpop.f32.mrf.mxu1 }
 0x347   : > { %v1431_v39 = vmax.f32 %v1307_v30, 0.0  ;;  %v1463_v34 = vpack.c.bf16 %v1433_v31, %v1432_v32  ;;  %v1328_v45 = vadd.f32 %v2144_v35, %v2599_v37 }
 0x348   : > { %v1319_v40 = vpop.f32.mrf.mxu1 }
 0x349   : > { %v1462_v41 = vpack.c.bf16 %v1431_v39, %v1430_v38  ;;  %v1320_v43 = vadd.f32 %v1319_v40, %v2599_v37  ;;  %v1436_v53 = vmax.f32 %v1328_v45, 0.0 }
 0x34a   : > { %v2145_v42 = vpop.f32.mrf.mxu1 }
 0x34b   : > { %v1331_v44 = vadd.f32 %v2145_v42, %v2599_v37  ;;  %2186 = vmatprep.mubr.bf16.mxu0 %v1462_v41  ;;  %v1434_v51 = vmax.f32 %v1320_v43, 0.0 }
 0x34c   : > { %v1322_v47 = vpop.f32.mrf.mxu1  ;;  %2187 = vmatmul.mubr.bf16.vlgmr.msra.gmra.mxu0 %v1463_v34 }
 0x34d   : > { %v1323_v48 = vadd.f32 %v1322_v47, %v2599_v37  ;;  %v1437_v49 = vmax.f32 %v1331_v44, 0.0 }
 0x34e   : > { %v2148_v50 = vpop.f32.mrf.mxu1 }
 0x34f   : > { %v1435_v52 = vmax.f32 %v1323_v48, 0.0  ;;  %v1465_v57 = vpack.c.bf16 %v1437_v49, %v1436_v53  ;;  %v1344_v61 = vadd.f32 %v2148_v50, %v2599_v37 }
 0x350   : > { %v1335_v54 = vpop.f32.mrf.mxu1 }
 0x351   : > { %v1464_v56 = vpack.c.bf16 %v1435_v52, %v1434_v51  ;;  %v1336_v59 = vadd.f32 %v1335_v54, %v2599_v37  ;;  %v1440_v3 = vmax.f32 %v1344_v61, 0.0 }
 0x352   : > { %v2149_v58 = vpop.f32.mrf.mxu1 }
 0x353   : > { %v1347_v60 = vadd.f32 %v2149_v58, %v2599_v37  ;;  %2190 = vmatprep.mubr.bf16.mxu0 %v1464_v56  ;;  %v1438_v1 = vmax.f32 %v1336_v59, 0.0 }
 0x354   : > { %v1338_v62 = vpop.f32.mrf.mxu1  ;;  %2191 = vmatmul.mubr.bf16.gmra.mxu0 %v1465_v57 }
 0x355   : > { %v1339_v63 = vadd.f32 %v1338_v62, %v2599_v37  ;;  %v1441_v46 = vmax.f32 %v1347_v60, 0.0 }
 0x356   : > { %v2152_v55 = vpop.f32.mrf.mxu1 }
 0x357   : > { %v1439_v2 = vmax.f32 %v1339_v63, 0.0  ;;  %v1467_v6 = vpack.c.bf16 %v1441_v46, %v1440_v3  ;;  %v1360_v11 = vadd.f32 %v2152_v55, %v2599_v37 }
 0x358   : > { %v1351_v4 = vpop.f32.mrf.mxu1 }
 0x359   : > { %v1466_v5 = vpack.c.bf16 %v1439_v2, %v1438_v1  ;;  %v1352_v8 = vadd.f32 %v1351_v4, %v2599_v37  ;;  %v1444_v16 = vmax.f32 %v1360_v11, 0.0 }
 0x35a   : > { %v2153_v7 = vpop.f32.mrf.mxu1 }
 0x35b   : > { %v1363_v10 = vadd.f32 %v2153_v7, %v2599_v37  ;;  %2194 = vmatprep.mubr.bf16.mxu0 %v1466_v5  ;;  %v1442_v14 = vmax.f32 %v1352_v8, 0.0 }
 0x35c   : > { %v1354_v12 = vpop.f32.mrf.mxu1  ;;  %2195 = vmatmul.mubr.bf16.gmra.mxu0 %v1467_v6 }
 0x35d   : > { %v1355_v0 = vadd.f32 %v1354_v12, %v2599_v37  ;;  %v1445_v9 = vmax.f32 %v1363_v10, 0.0 }
 0x35e   : > { %v2156_v13 = vpop.f32.mrf.mxu1 }
 0x35f   : > { %v1443_v15 = vmax.f32 %v1355_v0, 0.0  ;;  %v1469_v20 = vpack.c.bf16 %v1445_v9, %v1444_v16  ;;  %v1376_v18 = vadd.f32 %v2156_v13, %v2599_v37  ;;  %v2637_v0 = vld [vmem:[%s2748_s5] ss:$0 sm:$0xff] }
 0x360   : > { %v1367_v17 = vpop.f32.mrf.mxu1 }
 0x361   : > { %v1468_v19 = vpack.c.bf16 %v1443_v15, %v1442_v14  ;;  %v1368_v22 = vadd.f32 %v1367_v17, %v2599_v37  ;;  %v1448_v28 = vmax.f32 %v1376_v18, 0.0 }
 0x362   : > { %v2157_v21 = vpop.f32.mrf.mxu1 }
 0x363   : > { %v1379_v23 = vadd.f32 %v2157_v21, %v2599_v37  ;;  %2198 = vmatprep.mubr.bf16.mxu0 %v1468_v19  ;;  %v1446_v26 = vmax.f32 %v1368_v22, 0.0 }
 0x364   : > { %v1370_v24 = vpop.f32.mrf.mxu1  ;;  %2199 = vmatmul.mubr.bf16.gmra.mxu0 %v1469_v20 }
 0x365   : > { %v1371_v36 = vadd.f32 %v1370_v24, %v2599_v37  ;;  %v1449_v33 = vmax.f32 %v1379_v23, 0.0 }
 0x366   : > { %v2160_v25 = vpop.f32.mrf.mxu1 }
 0x367   : > { %v1447_v27 = vmax.f32 %v1371_v36, 0.0  ;;  %v1471_v31 = vpack.c.bf16 %v1449_v33, %v1448_v28  ;;  %v1392_v32 = vadd.f32 %v2160_v25, %v2599_v37 }
 0x368   : > { %v1383_v29 = vpop.f32.mrf.mxu1 }
 0x369   : > { %v1470_v30 = vpack.c.bf16 %v1447_v27, %v1446_v26  ;;  %v1384_v38 = vadd.f32 %v1383_v29, %v2599_v37  ;;  %v1452_v45 = vmax.f32 %v1392_v32, 0.0 }
 0x36a   : > { %v2161_v35 = vpop.f32.mrf.mxu1 }
 0x36b   : > { %v1395_v39 = vadd.f32 %v2161_v35, %v2599_v37  ;;  %2202 = vmatprep.mubr.bf16.mxu0 %v1470_v30  ;;  %v1450_v43 = vmax.f32 %v1384_v38, 0.0 }
 0x36c   : > { %v1386_v40 = vpop.f32.mrf.mxu1  ;;  %2203 = vmatmul.mubr.bf16.gmra.mxu0 %v1471_v31 }
 0x36d   : > { %v1387_v41 = vadd.f32 %v1386_v40, %v2599_v37  ;;  %v1453_v34 = vmax.f32 %v1395_v39, 0.0 }
 0x36e   : > { %v2164_v42 = vpop.f32.mrf.mxu1 }
 0x36f   : > { %v1451_v44 = vmax.f32 %v1387_v41, 0.0  ;;  %v1473_v49 = vpack.c.bf16 %v1453_v34, %v1452_v45  ;;  %v1408_v53 = vadd.f32 %v2164_v42, %v2599_v37 }
 0x370   : > { %v1399_v47 = vpop.f32.mrf.mxu1 }
 0x371   : > { %v1472_v48 = vpack.c.bf16 %v1451_v44, %v1450_v43  ;;  %v1400_v51 = vadd.f32 %v1399_v47, %v2599_v37  ;;  %v1456_v61 = vmax.f32 %v1408_v53, 0.0 }
 0x372   : > { %v2165_v50 = vpop.f32.mrf.mxu1 }
 0x373   : > { %v1411_v52 = vadd.f32 %v2165_v50, %v2599_v37  ;;  %2206 = vmatprep.mubr.bf16.mxu0 %v1472_v48  ;;  %v1454_v59 = vmax.f32 %v1400_v51, 0.0 }
 0x374   : > { %v1402_v54 = vpop.f32.mrf.mxu1  ;;  %2207 = vmatmul.mubr.bf16.gmra.mxu0 %v1473_v49 }
 0x375   : > { %v1403_v56 = vadd.f32 %v1402_v54, %v2599_v37  ;;  %v1457_v57 = vmax.f32 %v1411_v52, 0.0 }
 0x376   : > { %v2168_v58 = vpop.f32.mrf.mxu1 }
 0x377   : > { %v1455_v60 = vmax.f32 %v1403_v56, 0.0  ;;  %v1475_v46 = vpack.c.bf16 %v1457_v57, %v1456_v61  ;;  %v1424_v3 = vadd.f32 %v2168_v58, %v2599_v37 }
 0x378   : > { %v1415_v62 = vpop.f32.mrf.mxu1 }
 0x379   : > { %v1474_v63 = vpack.c.bf16 %v1455_v60, %v1454_v59  ;;  %v1416_v1 = vadd.f32 %v1415_v62, %v2599_v37  ;;  %v1460_v10 = vmax.f32 %v1424_v3, 0.0 }
 0x37a   : > { %v2169_v55 = vpop.f32.mrf.mxu1 }
 0x37b   : > { %v1427_v2 = vadd.f32 %v2169_v55, %v2599_v37  ;;  %2210 = vmatprep.mubr.bf16.mxu0 %v1474_v63  ;;  %v1458_v7 = vmax.f32 %v1416_v1, 0.0 }
 0x37c   : > { %v1418_v4 = vpop.f32.mrf.mxu1  ;;  %2211 = vmatmul.mubr.bf16.gmra.mxu0 %v1475_v46 }
 0x37d   : > { %v1419_v5 = vadd.f32 %v1418_v4, %v2599_v37  ;;  %v1461_v6 = vmax.f32 %v1427_v2, 0.0 }
 0x37f   : > { %v1459_v8 = vmax.f32 %v1419_v5, 0.0  ;;  %v1477_v12 = vpack.c.bf16 %v1461_v6, %v1460_v10 }
 0x381   : > { %v1476_v11 = vpack.c.bf16 %v1459_v8, %v1458_v7 }
 0x383   : > { %2214 = vmatprep.mubr.bf16.mxu0 %v1476_v11 }
 0x384   : > { %2215 = vmatmul.mubr.bf16.gmra.mxu0 %v1477_v12 }
 0x40c   : > { %v2188_v37 = vpop.f32.mrf.mxu0 }
 0x40d   : > { %v1592_v9 = vadd.f32 %v2188_v37, %v2637_v0 }
 0x40e   : > { %v1583_v13 = vpop.f32.mrf.mxu0 }
 0x40f   : > { %1712 = vst.msk [vmem:[%s2642_s13 + $0x10] sm:$0xff] %vm389_vm0, %v1592_v9  ;;  %v1584_v14 = vadd.f32 %v2637_v0, %v1583_v13 }
 0x410   : > { %v2189_v15 = vpop.f32.mrf.mxu0 }
 0x411   : > { %1710 = vst.msk [vmem:[%s2642_s13] sm:$0xff] %vm389_vm0, %v1584_v14  ;;  %v1595_v16 = vadd.f32 %v2189_v15, %v2637_v0 }
 0x412   : > { %v1586_v17 = vpop.f32.mrf.mxu0 }
 0x413   : > { %1713 = vst.msk [vmem:[%s2642_s13 + $0x18] sm:$0xff] %vm389_vm0, %v1595_v16  ;;  %v1587_v19 = vadd.f32 %v2637_v0, %v1586_v17 }
 0x414   : > { %v2192_v20 = vpop.f32.mrf.mxu0 }
 0x415   : > { %1711 = vst.msk [vmem:[%s2642_s13 + $0x8] sm:$0xff] %vm389_vm0, %v1587_v19  ;;  %v1608_v21 = vadd.f32 %v2192_v20, %v2637_v0 }
 0x416   : > { %v1599_v22 = vpop.f32.mrf.mxu0 }
 0x417   : > { %1716 = vst.msk [vmem:[%s2642_s13 + $0x30] sm:$0xff] %vm389_vm0, %v1608_v21  ;;  %v1600_v23 = vadd.f32 %v2637_v0, %v1599_v22 }
 0x418   : > { %v2193_v18 = vpop.f32.mrf.mxu0 }
 0x419   : > { %1714 = vst.msk [vmem:[%s2642_s13 + $0x20] sm:$0xff] %vm389_vm0, %v1600_v23  ;;  %v1611_v24 = vadd.f32 %v2193_v18, %v2637_v0 }
 0x41a   : > { %v1602_v36 = vpop.f32.mrf.mxu0 }
 0x41b   : > { %1717 = vst.msk [vmem:[%s2642_s13 + $0x38] sm:$0xff] %vm389_vm0, %v1611_v24  ;;  %v1603_v33 = vadd.f32 %v2637_v0, %v1602_v36 }
 0x41c   : > { %v2196_v25 = vpop.f32.mrf.mxu0 }
 0x41d   : > { %1715 = vst.msk [vmem:[%s2642_s13 + $0x28] sm:$0xff] %vm389_vm0, %v1603_v33  ;;  %v1624_v26 = vadd.f32 %v2196_v25, %v2637_v0 }
 0x41e   : > { %v1615_v27 = vpop.f32.mrf.mxu0 }
 0x41f   : > { %1720 = vst.msk [vmem:[%s2642_s13 + $0x50] sm:$0xff] %vm389_vm0, %v1624_v26  ;;  %v1616_v28 = vadd.f32 %v2637_v0, %v1615_v27 }
 0x420   : > { %v2197_v29 = vpop.f32.mrf.mxu0 }
 0x421   : > { %1718 = vst.msk [vmem:[%s2642_s13 + $0x40] sm:$0xff] %vm389_vm0, %v1616_v28  ;;  %v1627_v30 = vadd.f32 %v2197_v29, %v2637_v0 }
 0x422   : > { %v1618_v31 = vpop.f32.mrf.mxu0 }
 0x423   : > { %1721 = vst.msk [vmem:[%s2642_s13 + $0x58] sm:$0xff] %vm389_vm0, %v1627_v30  ;;  %v1619_v35 = vadd.f32 %v2637_v0, %v1618_v31 }
 0x424   : > { %v2200_v38 = vpop.f32.mrf.mxu0 }
 0x425   : > { %1719 = vst.msk [vmem:[%s2642_s13 + $0x48] sm:$0xff] %vm389_vm0, %v1619_v35  ;;  %v1640_v39 = vadd.f32 %v2200_v38, %v2637_v0 }
 0x426   : > { %v1631_v32 = vpop.f32.mrf.mxu0 }
 0x427   : > { %1724 = vst.msk [vmem:[%s2642_s13 + $0x70] sm:$0xff] %vm389_vm0, %v1640_v39  ;;  %v1632_v40 = vadd.f32 %v2637_v0, %v1631_v32 }
 0x428   : > { %v2201_v41 = vpop.f32.mrf.mxu0 }
 0x429   : > { %1722 = vst.msk [vmem:[%s2642_s13 + $0x60] sm:$0xff] %vm389_vm0, %v1632_v40  ;;  %v1643_v34 = vadd.f32 %v2201_v41, %v2637_v0 }
 0x42a   : > { %v1634_v42 = vpop.f32.mrf.mxu0 }
 0x42b   : > { %1725 = vst.msk [vmem:[%s2642_s13 + $0x78] sm:$0xff] %vm389_vm0, %v1643_v34  ;;  %v1635_v43 = vadd.f32 %v2637_v0, %v1634_v42 }
 0x42c   : > { %v2204_v44 = vpop.f32.mrf.mxu0 }
 0x42d   : > { %1723 = vst.msk [vmem:[%s2642_s13 + $0x68] sm:$0xff] %vm389_vm0, %v1635_v43  ;;  %v1656_v45 = vadd.f32 %v2204_v44, %v2637_v0 }
 0x42e   : > { %v1647_v47 = vpop.f32.mrf.mxu0 }
 0x42f   : > { %1728 = vst.msk [vmem:[%s2642_s13 + $0x90] sm:$0xff] %vm389_vm0, %v1656_v45  ;;  %v1648_v48 = vadd.f32 %v2637_v0, %v1647_v47 }
 0x430   : > { %v2205_v49 = vpop.f32.mrf.mxu0 }
 0x431   : > { %1726 = vst.msk [vmem:[%s2642_s13 + $0x80] sm:$0xff] %vm389_vm0, %v1648_v48  ;;  %v1659_v50 = vadd.f32 %v2205_v49, %v2637_v0 }
 0x432   : > { %v1650_v51 = vpop.f32.mrf.mxu0 }
 0x433   : > { %1729 = vst.msk [vmem:[%s2642_s13 + $0x98] sm:$0xff] %vm389_vm0, %v1659_v50  ;;  %v1651_v52 = vadd.f32 %v2637_v0, %v1650_v51 }
 0x434   : > { %v2208_v53 = vpop.f32.mrf.mxu0 }
 0x435   : > { %1727 = vst.msk [vmem:[%s2642_s13 + $0x88] sm:$0xff] %vm389_vm0, %v1651_v52  ;;  %v1672_v54 = vadd.f32 %v2208_v53, %v2637_v0 }
 0x436   : > { %v1663_v56 = vpop.f32.mrf.mxu0 }
 0x437   : > { %1732 = vst.msk [vmem:[%s2642_s13 + $0xb0] sm:$0xff] %vm389_vm0, %v1672_v54  ;;  %v1664_v57 = vadd.f32 %v2637_v0, %v1663_v56 }
 0x438   : > { %v2209_v58 = vpop.f32.mrf.mxu0 }
 0x439   : > { %1730 = vst.msk [vmem:[%s2642_s13 + $0xa0] sm:$0xff] %vm389_vm0, %v1664_v57  ;;  %v1675_v59 = vadd.f32 %v2209_v58, %v2637_v0 }
 0x43a   : > { %v1666_v60 = vpop.f32.mrf.mxu0 }
 0x43b   : > { %1733 = vst.msk [vmem:[%s2642_s13 + $0xb8] sm:$0xff] %vm389_vm0, %v1675_v59  ;;  %v1667_v61 = vadd.f32 %v2637_v0, %v1666_v60 }
 0x43c   : > { %v2212_v62 = vpop.f32.mrf.mxu0 }
 0x43d   : > { %1731 = vst.msk [vmem:[%s2642_s13 + $0xa8] sm:$0xff] %vm389_vm0, %v1667_v61  ;;  %v1688_v63 = vadd.f32 %v2212_v62, %v2637_v0 }
 0x43e   : > { %v1679_v46 = vpop.f32.mrf.mxu0 }
 0x43f   : > { %1736 = vst.msk [vmem:[%s2642_s13 + $0xd0] sm:$0xff] %vm389_vm0, %v1688_v63  ;;  %v1680_v55 = vadd.f32 %v2637_v0, %v1679_v46 }
 0x440   : > { %v2213_v1 = vpop.f32.mrf.mxu0 }
 0x441   : > { %1734 = vst.msk [vmem:[%s2642_s13 + $0xc0] sm:$0xff] %vm389_vm0, %v1680_v55  ;;  %v1691_v2 = vadd.f32 %v2213_v1, %v2637_v0 }
 0x442   : > { %v1682_v3 = vpop.f32.mrf.mxu0 }
 0x443   : > { %1737 = vst.msk [vmem:[%s2642_s13 + $0xd8] sm:$0xff] %vm389_vm0, %v1691_v2  ;;  %v1683_v4 = vadd.f32 %v2637_v0, %v1682_v3 }
 0x444   : > { %v2216_v5 = vpop.f32.mrf.mxu0 }
 0x445   : > { %1735 = vst.msk [vmem:[%s2642_s13 + $0xc8] sm:$0xff] %vm389_vm0, %v1683_v4  ;;  %v1704_v6 = vadd.f32 %v2216_v5, %v2637_v0 }
 0x446   : > { %v1695_v7 = vpop.f32.mrf.mxu0 }
 0x447   : > { %1740 = vst.msk [vmem:[%s2642_s13 + $0xf0] sm:$0xff] %vm389_vm0, %v1704_v6  ;;  %v1696_v8 = vadd.f32 %v2637_v0, %v1695_v7 }
 0x448   : > { %v2217_v10 = vpop.f32.mrf.mxu0 }
 0x449   : > { %1738 = vst.msk [vmem:[%s2642_s13 + $0xe0] sm:$0xff] %vm389_vm0, %v1696_v8  ;;  %v1707_v11 = vadd.f32 %v2217_v10, %v2637_v0 }
 0x44a   : > { %v1698_v12 = vpop.f32.mrf.mxu0 }
 0x44b   : > { %1741 = vst.msk [vmem:[%s2642_s13 + $0xf8] sm:$0xff] %vm389_vm0, %v1707_v11  ;;  %v1699_v37 = vadd.f32 %v2637_v0, %v1698_v12 }
 0x44d   : > { %1739 = vst.msk [vmem:[%s2642_s13 + $0xe8] sm:$0xff] %vm389_vm0, %v1699_v37 }
 0x44e PF: > { %s16_s21 = sadd.s32 1, %s2286_s21  }
 0x44f   : > { %p13_p4 = scmp.ge.s32.totalorder %s16_s21, 4  }
 0x451   :  { %15 = sbr.rel (!%p13_p4) target bundleno = 1 (0x1), region = 74 }

</bundles_post_ra>
